<compile_context>
chip_gen: v6e
topology: v6e:2x2x1
jax: 0.10.0
libtpu: 0.0.40
codegen_flags: <defaults>
</compile_context>

<pallas_src>
import functools

import jax
import jax.numpy as jnp
from jax.experimental import pallas as pl
from jax.experimental.pallas import tpu as pltpu

IN_DIM = 2      # [x, t]
HIDDEN = 32
OUT_DIM = 1

_TILE_QUANTUM = 512     # lane-axis tile granularity (multiple of 128)
_MAX_TILE = 8192        # cap: (32, 8192) f32 intermediates ~ 1 MiB
_TARGET_STEPS = 8       # keep a few grid steps so v7x's 2 TCs both get work


def _dnn_kernel(x0_ref, x1_ref, w23_ref, wvec_ref, o_ref, *, act_dtype):
    """MLP forward for one lane-tile of TN collocation points (batch on lanes).

    Shapes inside the kernel:
      x0_ref, x1_ref : (1, TN)            f32 rows = x / t coordinates
      w23_ref        : (2, HIDDEN, HIDDEN) PyTorch (out, in) weights of layers 2/3
      wvec_ref       : (7, HIDDEN, 1)     [w1[:,0], w1[:,1], b1, b2, b3, w4^T, b4]
      o_ref          : (OUT_DIM, TN)
    """
    w1c0 = wvec_ref[0]                 # (HIDDEN, 1)
    w1c1 = wvec_ref[1]
    b1 = wvec_ref[2]
    b2 = wvec_ref[3]
    b3 = wvec_ref[4]
    w4t = wvec_ref[5]
    b4 = wvec_ref[6][0:1, :]           # (1, 1)

    x0 = x0_ref[...]                   # (1, TN)
    x1 = x1_ref[...]

    def act(z):
        # tanh on the activation dtype (bf16 opt-in on v6e/v7x; f32 default).
        return jnp.tanh(z.astype(act_dtype))

    # Layer 1 (K=2): two broadcast FMAs on the VPU instead of a padded MXU pass.
    h = act(w1c0 * x0 + w1c1 * x1 + b1)                          # (HIDDEN, TN)

    # Layers 2 & 3: the real 32x32 MXU matmuls, f32 accumulation.
    w2 = w23_ref[0].astype(act_dtype)
    w3 = w23_ref[1].astype(act_dtype)
    h = act(jnp.dot(w2, h, preferred_element_type=jnp.float32) + b2)
    h = act(jnp.dot(w3, h, preferred_element_type=jnp.float32) + b3)

    # Layer 4 (out dim 1): 32-element sublane reduction (XLU) instead of MXU.
    out = jnp.sum(w4t * h.astype(jnp.float32), axis=0, keepdims=True) + b4
    o_ref[...] = out.astype(o_ref.dtype)


def _pick_tile(n):
    """Lane-axis tile: big enough to amortize the ~0.35us per-grid-step overhead,
    small enough that grid_n >= 2 (both v7x TCs get work at moderate N)."""
    tn = _TILE_QUANTUM * pl.cdiv(n, _TILE_QUANTUM * _TARGET_STEPS)
    return int(min(max(tn, _TILE_QUANTUM), _MAX_TILE))


@functools.partial(jax.jit, static_argnames=("activation_dtype",))
def nn_forward(x, t, params, activation_dtype=jnp.float32):
    """PINN `NN(x, t)` path: x, t are (N, 1) (or (N,)) coordinate columns.

    Equivalent to DNN(architecture)(torch.cat([x, t], dim=1)) but without the
    host-side concat/transpose — batch rides the 128-lane axis inside the kernel.
    Returns (N, OUT_DIM) float32.
    """
    x_row = jnp.reshape(x, (1, -1)).astype(jnp.float32)          # (1, N) - free
    t_row = jnp.reshape(t, (1, -1)).astype(jnp.float32)
    n = x_row.shape[1]

    tn = _pick_tile(n)
    grid_n = pl.cdiv(n, tn)
    n_pad = grid_n * tn
    if n_pad != n:                                               # pad tail tile only
        pad = ((0, 0), (0, n_pad - n))
        x_row = jnp.pad(x_row, pad)
        t_row = jnp.pad(t_row, pad)

    # Pack the 9 tiny constants into 2 operands (fewer prologue DMAs / buffers).
    w23 = jnp.stack([params["w2"], params["w3"]], axis=0).astype(jnp.float32)
    wvec = jnp.stack(
        [
            params["w1"][:, 0], params["w1"][:, 1],
            params["b1"], params["b2"], params["b3"],
            params["w4"][0, :],
            jnp.full((HIDDEN,), params["b4"][0], jnp.float32),
        ],
        axis=0,
    ).astype(jnp.float32).reshape(7, HIDDEN, 1)

    kernel = functools.partial(_dnn_kernel, act_dtype=jnp.dtype(activation_dtype))

    weight_bytes = 4 * (int(w23.size) + int(wvec.size))
    cost = pl.CostEstimate(
        flops=2 * n_pad * (IN_DIM * HIDDEN + 2 * HIDDEN * HIDDEN + HIDDEN * OUT_DIM),
        transcendentals=3 * n_pad * HIDDEN,
        bytes_accessed=n_pad * (IN_DIM + OUT_DIM) * 4 + weight_bytes,
    )

    out = pl.pallas_call(
        kernel,
        out_shape=jax.ShapeDtypeStruct((OUT_DIM, n_pad), jnp.float32),
        grid=(grid_n,),
        in_specs=[
            pl.BlockSpec((1, tn), lambda i: (0, i)),             # x row tile
            pl.BlockSpec((1, tn), lambda i: (0, i)),             # t row tile
            pl.BlockSpec((2, HIDDEN, HIDDEN), lambda i: (0, 0, 0)),
            pl.BlockSpec((7, HIDDEN, 1), lambda i: (0, 0, 0)),
        ],
        out_specs=pl.BlockSpec((OUT_DIM, tn), lambda i: (0, i)),  # lane-dense store
        compiler_params=pltpu.CompilerParams(
            dimension_semantics=("parallel",)),
        cost_estimate=cost,
    )(x_row, t_row, w23, wvec)

    # (1, n_pad) -> drop padding -> (N, 1); same element order, so reshape only.
    return out[:, :n].reshape(n, OUT_DIM)


@functools.partial(jax.jit, static_argnames=("activation_dtype",))
def dnn_forward(xcat, params, activation_dtype=jnp.float32):
    """DNN.forward semantics: xcat = torch.cat([x, t], dim=1), shape (N, IN_DIM)."""
    return nn_forward(xcat[:, 0], xcat[:, 1], params,
                      activation_dtype=activation_dtype)


def init_params(key):
    """PyTorch-shaped params: w (out, in), b (out,), init U[-1/sqrt(fan_in), +]."""
    dims = [IN_DIM, HIDDEN, HIDDEN, HIDDEN, OUT_DIM]
    params = {}
    for li in range(4):
        fan_in, fan_out = dims[li], dims[li + 1]
        key, kw, kb = jax.random.split(key, 3)
        bound = 1.0 / jnp.sqrt(fan_in)
        params[f"w{li + 1}"] = jax.random.uniform(
            kw, (fan_out, fan_in), jnp.float32, -bound, bound)
        params[f"b{li + 1}"] = jax.random.uniform(
            kb, (fan_out,), jnp.float32, -bound, bound)
    return params


def dnn_forward_ref(x, params):
    """Pure-JAX reference of the same MLP (PyTorch layout) for correctness."""
    h = x
    for li in (1, 2, 3):
        h = jnp.tanh(
            jnp.dot(h, params[f"w{li}"].T, precision=jax.lax.Precision.HIGHEST)
            + params[f"b{li}"])
    return (jnp.dot(h, params["w4"].T, precision=jax.lax.Precision.HIGHEST)
            + params["b4"])


if __name__ == "__main__":
    key = jax.random.PRNGKey(0)
    key_p, key_x = jax.random.split(key)

    params = init_params(key_p)

    # Collocation batch: 1000 (x, t) points — deliberately NOT a multiple of the
    # lane tile, exercising the tail-padding path and a 2-step parallel grid.
    n = 1000
    x_pts = jax.random.uniform(key_x, (n, 1), jnp.float32)            # spatial coord
    t_pts = (jnp.arange(n, dtype=jnp.float32) / n).reshape(n, 1)      # time coord
    inp = jnp.concatenate([x_pts, t_pts], axis=1)                     # (N, 2)

    # DNN.forward path (concatenated input, like self.dnn(torch.cat([x, t], 1))).
    out = jax.block_until_ready(dnn_forward(inp, params))
    ref = dnn_forward_ref(inp, params)

    assert out.shape == (n, OUT_DIM)
    err = float(jnp.max(jnp.abs(out - ref)))
    # Tolerance accounts for MXU default-precision f32 (bf16-pass) accumulation in
    # the two 32x32 matmuls vs. the Precision.HIGHEST reference.
    assert err < 2e-3, err

    # PINN NN(x, t) path (no concat/transpose) must match the concatenated path.
    out2 = jax.block_until_ready(nn_forward(x_pts, t_pts, params))
    assert out2.shape == (n, OUT_DIM)
    assert jnp.allclose(out2, out, atol=1e-6, rtol=0.0)

    print("KERNEL_OK")
</pallas_src>

<mosaic_0001>
module attributes {stable_mosaic.version = 11 : i64} {
  func.func @_dnn_kernel(%arg0: i32, %arg1: memref<1x512xf32, #tpu.memory_space<vmem>>, %arg2: memref<1x512xf32, #tpu.memory_space<vmem>>, %arg3: memref<2x32x32xf32, #tpu.memory_space<vmem>>, %arg4: memref<7x32x1xf32, #tpu.memory_space<vmem>>, %arg5: memref<1x512xf32, #tpu.memory_space<vmem>>) attributes {dimension_semantics = [#tpu.dimension_semantics<parallel>], iteration_bounds = array<i64: 2>, scalar_prefetch = 0 : i64, scratch_operands = 0 : i64, tpu.core_type = #tpu.core_type<tc>, window_params = [{transform_indices = @transform_0, window_bounds = array<i64: 1, 512>}, {transform_indices = @transform_1, window_bounds = array<i64: 1, 512>}, {pipeline_mode = #tpu.pipeline_mode<synchronous>, transform_indices = @transform_2, window_bounds = array<i64: 2, 32, 32>}, {pipeline_mode = #tpu.pipeline_mode<synchronous>, transform_indices = @transform_3, window_bounds = array<i64: 7, 32, 1>}, {transform_indices = @transform_4, window_bounds = array<i64: 1, 512>}]} {
    %c0 = arith.constant 0 : index
    %c0_0 = arith.constant 0 : index
    %c0_1 = arith.constant 0 : index
    %0 = vector.load %arg4[%c0, %c0_0, %c0_1] : memref<7x32x1xf32, #tpu.memory_space<vmem>>, vector<1x32x1xf32>
    %1 = vector.shape_cast %0 : vector<1x32x1xf32> to vector<32x1xf32>
    %c1 = arith.constant 1 : index
    %c0_2 = arith.constant 0 : index
    %c0_3 = arith.constant 0 : index
    %2 = vector.load %arg4[%c1, %c0_2, %c0_3] : memref<7x32x1xf32, #tpu.memory_space<vmem>>, vector<1x32x1xf32>
    %3 = vector.shape_cast %2 : vector<1x32x1xf32> to vector<32x1xf32>
    %c2 = arith.constant 2 : index
    %c0_4 = arith.constant 0 : index
    %c0_5 = arith.constant 0 : index
    %4 = vector.load %arg4[%c2, %c0_4, %c0_5] : memref<7x32x1xf32, #tpu.memory_space<vmem>>, vector<1x32x1xf32>
    %5 = vector.shape_cast %4 : vector<1x32x1xf32> to vector<32x1xf32>
    %c3 = arith.constant 3 : index
    %c0_6 = arith.constant 0 : index
    %c0_7 = arith.constant 0 : index
    %6 = vector.load %arg4[%c3, %c0_6, %c0_7] : memref<7x32x1xf32, #tpu.memory_space<vmem>>, vector<1x32x1xf32>
    %7 = vector.shape_cast %6 : vector<1x32x1xf32> to vector<32x1xf32>
    %c4 = arith.constant 4 : index
    %c0_8 = arith.constant 0 : index
    %c0_9 = arith.constant 0 : index
    %8 = vector.load %arg4[%c4, %c0_8, %c0_9] : memref<7x32x1xf32, #tpu.memory_space<vmem>>, vector<1x32x1xf32>
    %9 = vector.shape_cast %8 : vector<1x32x1xf32> to vector<32x1xf32>
    %c5 = arith.constant 5 : index
    %c0_10 = arith.constant 0 : index
    %c0_11 = arith.constant 0 : index
    %10 = vector.load %arg4[%c5, %c0_10, %c0_11] : memref<7x32x1xf32, #tpu.memory_space<vmem>>, vector<1x32x1xf32>
    %11 = vector.shape_cast %10 : vector<1x32x1xf32> to vector<32x1xf32>
    %c6 = arith.constant 6 : index
    %c0_12 = arith.constant 0 : index
    %c0_13 = arith.constant 0 : index
    %12 = vector.load %arg4[%c6, %c0_12, %c0_13] : memref<7x32x1xf32, #tpu.memory_space<vmem>>, vector<1x32x1xf32>
    %13 = vector.shape_cast %12 : vector<1x32x1xf32> to vector<32x1xf32>
    %14 = vector.extract_strided_slice %13 {offsets = [0, 0], sizes = [1, 1], strides = [1, 1]} : vector<32x1xf32> to vector<1x1xf32>
    %c0_14 = arith.constant 0 : index
    %c0_15 = arith.constant 0 : index
    %15 = vector.load %arg1[%c0_14, %c0_15] : memref<1x512xf32, #tpu.memory_space<vmem>>, vector<1x512xf32>
    %c0_16 = arith.constant 0 : index
    %c0_17 = arith.constant 0 : index
    %16 = vector.load %arg2[%c0_16, %c0_17] : memref<1x512xf32, #tpu.memory_space<vmem>>, vector<1x512xf32>
    %17 = vector.broadcast %1 : vector<32x1xf32> to vector<32x512xf32>
    %18 = vector.broadcast %15 : vector<1x512xf32> to vector<32x512xf32>
    %19 = arith.mulf %17, %18 : vector<32x512xf32>
    %20 = vector.broadcast %3 : vector<32x1xf32> to vector<32x512xf32>
    %21 = vector.broadcast %16 : vector<1x512xf32> to vector<32x512xf32>
    %22 = arith.mulf %20, %21 : vector<32x512xf32>
    %23 = arith.addf %19, %22 : vector<32x512xf32>
    %24 = vector.broadcast %5 : vector<32x1xf32> to vector<32x512xf32>
    %25 = arith.addf %23, %24 : vector<32x512xf32>
    %26 = math.tanh %25 : vector<32x512xf32>
    %c0_18 = arith.constant 0 : index
    %c0_19 = arith.constant 0 : index
    %c0_20 = arith.constant 0 : index
    %27 = vector.load %arg3[%c0_18, %c0_19, %c0_20] : memref<2x32x32xf32, #tpu.memory_space<vmem>>, vector<1x32x32xf32>
    %28 = vector.shape_cast %27 : vector<1x32x32xf32> to vector<32x32xf32>
    %c1_21 = arith.constant 1 : index
    %c0_22 = arith.constant 0 : index
    %c0_23 = arith.constant 0 : index
    %29 = vector.load %arg3[%c1_21, %c0_22, %c0_23] : memref<2x32x32xf32, #tpu.memory_space<vmem>>, vector<1x32x32xf32>
    %30 = vector.shape_cast %29 : vector<1x32x32xf32> to vector<32x32xf32>
    %cst = arith.constant dense<0.000000e+00> : vector<32x512xf32>
    %31 = tpu.matmul %28, %26, %cst {dimension_numbers = #tpu.dot_dimension_numbers<[1], [0], [0], [1], [0, 0, 1, 1], [], []>} : vector<32x32xf32>, vector<32x512xf32>, vector<32x512xf32> -> vector<32x512xf32>
    %32 = vector.broadcast %7 : vector<32x1xf32> to vector<32x512xf32>
    %33 = arith.addf %31, %32 : vector<32x512xf32>
    %34 = math.tanh %33 : vector<32x512xf32>
    %cst_24 = arith.constant dense<0.000000e+00> : vector<32x512xf32>
    %35 = tpu.matmul %30, %34, %cst_24 {dimension_numbers = #tpu.dot_dimension_numbers<[1], [0], [0], [1], [0, 0, 1, 1], [], []>} : vector<32x32xf32>, vector<32x512xf32>, vector<32x512xf32> -> vector<32x512xf32>
    %36 = vector.broadcast %9 : vector<32x1xf32> to vector<32x512xf32>
    %37 = arith.addf %35, %36 : vector<32x512xf32>
    %38 = math.tanh %37 : vector<32x512xf32>
    %39 = vector.broadcast %11 : vector<32x1xf32> to vector<32x512xf32>
    %40 = arith.mulf %39, %38 : vector<32x512xf32>
    %cst_25 = arith.constant dense<0.000000e+00> : vector<512xf32>
    %41 = vector.multi_reduction <add>, %40, %cst_25 [0] : vector<32x512xf32> to vector<512xf32>
    %42 = vector.shape_cast %41 : vector<512xf32> to vector<1x512xf32>
    %43 = vector.broadcast %14 : vector<1x1xf32> to vector<1x512xf32>
    %44 = arith.addf %42, %43 : vector<1x512xf32>
    %c0_26 = arith.constant 0 : index
    %c0_27 = arith.constant 0 : index
    %45 = vector.load %arg5[%c0_26, %c0_27] : memref<1x512xf32, #tpu.memory_space<vmem>>, vector<1x512xf32>
    tpu.vector_store %arg5[%c0_26, %c0_27], %44 {strides = array<i32>} : memref<1x512xf32, #tpu.memory_space<vmem>>, vector<1x512xf32>,
    return
  }
  func.func @transform_0(%arg0: i32) -> (i32, i32) {
    %c0_i32 = arith.constant 0 : i32
    %c0_i32_0 = arith.constant 0 : i32
    return %c0_i32, %arg0 : i32, i32
  }
  func.func @transform_1(%arg0: i32) -> (i32, i32) {
    %c0_i32 = arith.constant 0 : i32
    %c0_i32_0 = arith.constant 0 : i32
    return %c0_i32, %arg0 : i32, i32
  }
  func.func @transform_2(%arg0: i32) -> (i32, i32, i32) {
    %c0_i32 = arith.constant 0 : i32
    %c0_i32_0 = arith.constant 0 : i32
    %c0_i32_1 = arith.constant 0 : i32
    %c0_i32_2 = arith.constant 0 : i32
    return %c0_i32, %c0_i32_0, %c0_i32_1 : i32, i32, i32
  }
  func.func @transform_3(%arg0: i32) -> (i32, i32, i32) {
    %c0_i32 = arith.constant 0 : i32
    %c0_i32_0 = arith.constant 0 : i32
    %c0_i32_1 = arith.constant 0 : i32
    %c0_i32_2 = arith.constant 0 : i32
    return %c0_i32, %c0_i32_0, %c0_i32_1 : i32, i32, i32
  }
  func.func @transform_4(%arg0: i32) -> (i32, i32) {
    %c0_i32 = arith.constant 0 : i32
    %c0_i32_0 = arith.constant 0 : i32
    return %c0_i32, %arg0 : i32, i32
  }
}

</mosaic_0001>

<bundles_post_ra>
// kernel: nn_forward.1
= control target key start
LH: loop header
LB: loop body
LE: loop exit
PB: predicated region body
PF: predicated region fallthrough
CT: control target
= control target key end

     0   :  { %s1259_s15 = smov 0   ;;  %s1444_s0 = inlined_call_operand.vmem [shape: f32[1,1024], index: 0, kind: input, shape index: {}]   ;;  %s1445_s1 = inlined_call_operand.vmem [shape: f32[1,1024], index: 1, kind: input, shape index: {}]   ;;  %s1446_s2 = inlined_call_operand.vmem [shape: f32[2,32,32], index: 2, kind: input, shape index: {}]   ;;  %s1447_s3 = inlined_call_operand.vmem [shape: f32[7,32,1], index: 3, kind: input, shape index: {}]   ;;  %s1448_s4 = inlined_call_operand.vmem [shape: f32[1,1024], index: 4, kind: output, shape index: {}]  }
   0x1 LB: > { %s1063_s16 = sadd.s32 4294967295, %s1229_s15   ;;  %p1067_p0 = scmp.ge.s32.totalorder %s1229_s15, 1  ;;  %s1229_s15 = sphi %s1259_s15, %s14_s15  }
   0x2   : > { %p172_p1 = scmp.lt.s32.totalorder %s1229_s15, 3 }
   0x4   : > { %p173_p2 = pnand %p1067_p0, %p172_p1 }
   0x5   : > { %s1068_s19 = sshll.u32 (!%p173_p2), %s1063_s16, 2 }
   0x6   : > { %176 = sbr.rel (%p173_p2) target bundleno = 664 (0x298), region = 36  ;;  %p201_p3 = scmp.lt.s32.totalorder (!%p173_p2), %s1068_s19, 7 }
   0xb   : > { %v218_v0 = vld [vmem:[%s1447_s3 + $0x18] sm:$0xff]  ;;  %v217_v1 = vld [vmem:[%s1447_s3 + $0x10] sm:$0xff]  ;;  %v1231_v2 = vmov 0   ;;  %v1072_v5 = vld [vmem:[%s1447_s3 + $0x28] sm:$0xff]  ;;  %v1232_v26 = vmov 0.0   ;;  %v269_v27 = vlaneseq  ;;  %s1450_s19 = smov (!%p201_p3, %s1068_s19), 7 }
   0xc   : > { %1126 = vset.pattern.permute.xlu1 %v1231_v2  ;;  %1125 = vset.pattern.permute.xlu0 %v1231_v2  ;;  %v1074_v3 = vld [vmem:[%s1447_s3 + $0x38] sm:$0xff]  ;;  %v1073_v4 = vld [vmem:[%s1447_s3 + $0x30] sm:$0xff]  ;;  %v216_v6 = vld [vmem:[%s1447_s3 + $0x8] sm:$0xff]  ;;  %s208_s22 = scalar_lea.vmem %s1445_s1, %s1450_s19  ;;  %s203_s16 = scalar_lea.vmem %s1444_s0, %s1450_s19  ;;  %vm459_vm0 = vcmask 261120  }
   0xd   : > { %265 = vperm.xlu0 %1125, %v218_v0   ;;  %260 = vperm.xlu1 %1126, %v217_v1   ;;  %v1078_v7 = vld [vmem:[%s1447_s3 + $0x58] sm:$0xff]  ;;  %v215_v8 = vld [vmem:[%s1447_s3] sm:$0xff]  ;;  %v1077_v10 = vld [vmem:[%s1447_s3 + $0x50] sm:$0xff]  ;;  %v1349_v30 = vshrl.u32 %v269_v27, 7  ;;  %vm1004_vm1 = vcmp.lt.s32.totalorder %v269_v27, 512  ;;  %s213_s20 = scalar_lea.vmem %s1448_s4, %s1450_s19 }
   0xe   : > { %v1071_v9 = vld [vmem:[%s1447_s3 + $0x20] sm:$0xff]  ;;  %v1076_v11 = vld [vmem:[%s1447_s3 + $0x48] sm:$0xff]  ;;  %v1082_v13 = vld [vmem:[%s1447_s3 + $0x78] sm:$0xff]  ;;  %536 = vmatprep.mubr.f32.mxu0 %v1232_v26  ;;  %625 = vmatprep.mubr.f32.mxu1 %v1232_v26 }
   0xf   : > { %v1075_v12 = vld [vmem:[%s1447_s3 + $0x40] sm:$0xff]  ;;  %v1081_v14 = vld [vmem:[%s1447_s3 + $0x70] sm:$0xff]  ;;  %v1080_v15 = vld [vmem:[%s1447_s3 + $0x68] sm:$0xff]  ;;  %v271_v33 = vsub.s32 0, %v1349_v30  ;;  %v275_v34 = vsub.s32 1, %v1349_v30  ;;  %v279_v35 = vsub.s32 2, %v1349_v30 }
  0x10   : > { %v1079_v16 = vld [vmem:[%s1447_s3 + $0x60] sm:$0xff]  ;;  %v1084_v18 = vld [vmem:[%s1447_s3 + $0x88] sm:$0xff]  ;;  %v1085_v19 = vld [vmem:[%s1447_s3 + $0x90] sm:$0xff]  ;;  %v283_v36 = vsub.s32 3, %v1349_v30 }
  0x11   : > { %322 = vperm.xlu0 %1125, %v1074_v3   ;;  %317 = vperm.xlu1 %1126, %v1073_v4   ;;  %v1083_v17 = vld [vmem:[%s1447_s3 + $0x80] sm:$0xff]  ;;  %v1086_v20 = vld [vmem:[%s1447_s3 + $0x98] sm:$0xff]  ;;  %v1088_v22 = vld [vmem:[%s1447_s3 + $0xa8] sm:$0xff] }
  0x12   : > { %v1087_v21 = vld [vmem:[%s1447_s3 + $0xa0] sm:$0xff]  ;;  %v1089_v23 = vld [vmem:[%s1447_s3 + $0xb0] sm:$0xff]  ;;  %v1090_v24 = vld [vmem:[%s1447_s3 + $0xb8] sm:$0xff] }
  0x13   : > { %v1091_v25 = vld [vmem:[%s1447_s3 + $0xc0] sm:$0xff] }
  0x14   : > { %v247_v37 = vld [vmem:[%s208_s22] sm:$0xf] }
  0x15   : > { %312 = vperm.xlu1 %1126, %v1072_v5   ;;  %255 = vperm.xlu0 %1125, %v216_v6   ;;  %v246_v40 = vld [vmem:[%s203_s16] sm:$0xf]  ;;  %v329_v41 = vrot.slane %v247_v37, %v271_v33  ;;  %v1363_v42 = vrot.slane %v247_v37, %v279_v35  ;;  %v333_v48 = vrot.slane %v247_v37, %v275_v34 }
  0x16   : > { %v272_v43 = vrot.slane %v246_v40, %v271_v33  ;;  %v276_v44 = vrot.slane %v246_v40, %v275_v34  ;;  %v1365_v45 = vrot.slane %v246_v40, %v279_v35  ;;  %v284_v46 = vrot.slane %v246_v40, %v283_v36 }
  0x17   : > { %v341_v49 = vrot.slane %v247_v37, %v283_v36 }
  0x19   : > { %395 = vperm.xlu0 %1125, %v1078_v7   ;;  %250 = vperm.xlu1 %1126, %v215_v8  }
  0x1d   : > { %307 = vperm.xlu0 %1125, %v1071_v9   ;;  %390 = vperm.xlu1 %1126, %v1077_v10  }
  0x21   : > { %385 = vperm.xlu0 %1125, %v1076_v11   ;;  %380 = vperm.xlu1 %1126, %v1075_v12  }
  0x25   : > { %456 = vperm.xlu0 %1125, %v1082_v13   ;;  %451 = vperm.xlu1 %1126, %v1081_v14  }
  0x29   : > { %446 = vperm.xlu0 %1125, %v1080_v15   ;;  %441 = vperm.xlu1 %1126, %v1079_v16  }
  0x2d   : > { %668 = vperm.xlu0 %1125, %v1083_v17   ;;  %673 = vperm.xlu1 %1126, %v1084_v18  }
  0x31   : > { %678 = vperm.xlu0 %1125, %v1085_v19   ;;  %683 = vperm.xlu1 %1126, %v1086_v20  }
  0x35   : > { %894 = vperm.xlu0 %1125, %v1087_v21   ;;  %899 = vperm.xlu1 %1126, %v1088_v22  }
  0x39   : > { %904 = vperm.xlu0 %1125, %v1089_v23   ;;  %909 = vperm.xlu1 %1126, %v1090_v24  }
  0x3d   : > { %966 = vperm.xlu0 %1125, %v1091_v25  }
  0x88   : > { %v266_v28 = vpop.permute.xlu0 %265  ;;  %v261_v29 = vpop.permute.xlu1 %260 }
  0x89   : > { %v301_v53 = vmul.f32 %v272_v43, %v266_v28  ;;  %v302_v54 = vmul.f32 %v276_v44, %v266_v28  ;;  %v303_v55 = vmul.f32 %v1365_v45, %v266_v28  ;;  %v304_v56 = vmul.f32 %v284_v46, %v266_v28 }
  0x8a   : > { %v297_v57 = vmul.f32 %v272_v43, %v261_v29  ;;  %v298_v58 = vmul.f32 %v276_v44, %v261_v29  ;;  %v299_v59 = vmul.f32 %v1365_v45, %v261_v29  ;;  %v300_v61 = vmul.f32 %v284_v46, %v261_v29 }
  0x8c   : > { %v323_v31 = vpop.permute.xlu0 %322  ;;  %v318_v32 = vpop.permute.xlu1 %317 }
  0x8d   : > { %v358_v51 = vmul.f32 %v329_v41, %v323_v31  ;;  %v360_v52 = vmul.f32 %v1363_v42, %v323_v31  ;;  %v354_v60 = vmul.f32 %v329_v41, %v318_v32  ;;  %v359_v62 = vmul.f32 %v333_v48, %v323_v31 }
  0x8e   : > { %v361_v63 = vmul.f32 %v341_v49, %v323_v31  ;;  %v355_v0 = vmul.f32 %v333_v48, %v318_v32  ;;  %v356_v2 = vmul.f32 %v1363_v42, %v318_v32  ;;  %v357_v3 = vmul.f32 %v341_v49, %v318_v32 }
  0x8f   : > { %v374_v4 = vadd.f32 %v358_v51, %v301_v53  ;;  %v376_v5 = vadd.f32 %v360_v52, %v303_v55  ;;  %v370_v14 = vadd.f32 %v354_v60, %v297_v57  ;;  %v375_v21 = vadd.f32 %v359_v62, %v302_v54 }
  0x90   : > { %v313_v38 = vpop.permute.xlu1 %312  ;;  %v256_v39 = vpop.permute.xlu0 %255  ;;  %v371_v18 = vadd.f32 %v355_v0, %v298_v58  ;;  %v372_v19 = vadd.f32 %v356_v2, %v299_v59  ;;  %v377_v22 = vadd.f32 %v361_v63, %v304_v56  ;;  %v373_v23 = vadd.f32 %v357_v3, %v300_v61 }
  0x91   : > { %v350_v6 = vmul.f32 %v329_v41, %v313_v38  ;;  %v351_v7 = vmul.f32 %v333_v48, %v313_v38  ;;  %v293_v8 = vmul.f32 %v272_v43, %v256_v39  ;;  %v294_v9 = vmul.f32 %v276_v44, %v256_v39 }
  0x92   : > { %v352_v11 = vmul.f32 %v1363_v42, %v313_v38  ;;  %v295_v12 = vmul.f32 %v1365_v45, %v256_v39  ;;  %v353_v15 = vmul.f32 %v341_v49, %v313_v38  ;;  %v296_v16 = vmul.f32 %v284_v46, %v256_v39 }
  0x93   : > { %v366_v28 = vadd.f32 %v350_v6, %v293_v8  ;;  %v367_v29 = vadd.f32 %v351_v7, %v294_v9  ;;  %v430_v8 = vld [vmem:[%s1446_s2] sm:$0xff] }
  0x94   : > { %v1367_v47 = vpop.permute.xlu0 %395  ;;  %v251_v50 = vpop.permute.xlu1 %250  ;;  %v368_v33 = vadd.f32 %v352_v11, %v295_v12  ;;  %v369_v36 = vadd.f32 %v353_v15, %v296_v16  ;;  %v431_v11 = vld [vmem:[%s1446_s2 + $0x8] sm:$0xff]  ;;  %v432_v12 = vld [vmem:[%s1446_s2 + $0x10] sm:$0xff] }
  0x95   : > { %v410_v13 = vadd.f32 %v1367_v47, %v374_v4  ;;  %v412_v17 = vadd.f32 %v1367_v47, %v376_v5  ;;  %v289_v37 = vmul.f32 %v272_v43, %v251_v50  ;;  %v290_v40 = vmul.f32 %v276_v44, %v251_v50 }
  0x96   : > { %v411_v52 = vadd.f32 %v1367_v47, %v375_v21  ;;  %v292_v53 = vmul.f32 %v284_v46, %v251_v50  ;;  %v291_v55 = vmul.f32 %v1365_v45, %v251_v50 }
  0x97   : > { %1127 = vtanh.f32 %v410_v13  ;;  %v433_v13 = vld [vmem:[%s1446_s2 + $0x18] sm:$0xff] }
  0x98   : > { %v308_v1 = vpop.permute.xlu0 %307  ;;  %v391_v10 = vpop.permute.xlu1 %390  ;;  %1129 = vtanh.f32 %v412_v17 }
  0x99   : > { %v406_v20 = vadd.f32 %v391_v10, %v370_v14  ;;  %v407_v24 = vadd.f32 %v391_v10, %v371_v18  ;;  %v346_v31 = vmul.f32 %v329_v41, %v308_v1  ;;  %v408_v32 = vadd.f32 %v391_v10, %v372_v19 }
  0x9a   : > { %v347_v34 = vmul.f32 %v333_v48, %v308_v1  ;;  %v409_v35 = vadd.f32 %v391_v10, %v373_v23  ;;  %v349_v38 = vmul.f32 %v341_v49, %v308_v1  ;;  %v348_v51 = vmul.f32 %v1363_v42, %v308_v1 }
  0x9b   : > { %1131 = vtanh.f32 %v406_v20  ;;  %v362_v54 = vadd.f32 %v346_v31, %v289_v37  ;;  %v413_v41 = vadd.f32 %v1367_v47, %v377_v22 }
  0x9c   : > { %v386_v25 = vpop.permute.xlu0 %385  ;;  %1133 = vtanh.f32 %v407_v24  ;;  %v381_v56 = vpop.permute.xlu1 %380  ;;  %v363_v43 = vadd.f32 %v347_v34, %v290_v40  ;;  %v365_v57 = vadd.f32 %v349_v38, %v292_v53  ;;  %v364_v58 = vadd.f32 %v348_v51, %v291_v55 }
  0x9d   : > { %v402_v39 = vadd.f32 %v386_v25, %v366_v28  ;;  %1135 = vtanh.f32 %v408_v32  ;;  %v403_v48 = vadd.f32 %v386_v25, %v367_v29  ;;  %v405_v49 = vadd.f32 %v386_v25, %v369_v36 }
  0x9e   : > { %1137 = vtanh.f32 %v409_v35  ;;  %v404_v44 = vadd.f32 %v386_v25, %v368_v33  ;;  %v398_v42 = vadd.f32 %v381_v56, %v362_v54  ;;  %v399_v46 = vadd.f32 %v381_v56, %v363_v43 }
  0x9f   : > { %1139 = vtanh.f32 %v402_v39  ;;  %v401_v59 = vadd.f32 %v381_v56, %v365_v57  ;;  %v400_v47 = vadd.f32 %v381_v56, %v364_v58 }
  0xa0   : > { %1141 = vtanh.f32 %v411_v52  ;;  %v452_v14 = vpop.permute.xlu1 %451  ;;  %v457_v16 = vpop.permute.xlu0 %456 }
  0xa1   : > { %1143 = vtanh.f32 %v413_v41 }
  0xa2   : > { %1145 = vtanh.f32 %v403_v48 }
  0xa3   : > { %1147 = vtanh.f32 %v405_v49 }
  0xa4   : > { %1149 = vtanh.f32 %v404_v44  ;;  %v1128_v45 = vpop.eup %1127  ;;  %v442_v21 = vpop.permute.xlu1 %441 }
  0xa5   : > { %1151 = vtanh.f32 %v398_v42  ;;  %v1130_v50 = vpop.eup %1129  ;;  %v447_v25 = vpop.permute.xlu0 %446 }
  0xa6   : > { %1153 = vtanh.f32 %v399_v46 }
  0xa7   : > { %1155 = vtanh.f32 %v401_v59 }
  0xa8   : > { %v1132_v60 = vpop.eup %1131  ;;  %1157 = vtanh.f32 %v400_v47 }
  0xa9   : > { %v1134_v61 = vpop.eup %1133 }
  0xaa   : > { %v1136_v62 = vpop.eup %1135 }
  0xab   : > { %v1138_v63 = vpop.eup %1137 }
  0xac   : > { %v1140_v0 = vpop.eup %1139 }
  0xad   : > { %v1142_v1 = vpop.eup %1141 }
  0xae   : > { %v1144_v2 = vpop.eup %1143  ;;  %496 = vmatprep.subr.mxu0 %v1142_v1 }
  0xaf   : > { %v1146_v3 = vpop.eup %1145  ;;  %585 = vmatprep.subr.mxu1 %v1144_v2  ;;  %497 = vmatpush1.msra.mxu0 %v1128_v45 }
  0xb0   : > { %v1148_v4 = vpop.eup %1147  ;;  %586 = vmatpush1.msra.mxu1 %v1130_v50  ;;  %498 = vmatprep.subr.mxu0 %v1134_v61 }
  0xb1   : > { %v1150_v5 = vpop.eup %1149  ;;  %587 = vmatprep.subr.mxu1 %v1138_v63  ;;  %499 = vmatpush1.msra.mxu0 %v1132_v60 }
  0xb2   : > { %v1152_v6 = vpop.eup %1151  ;;  %588 = vmatpush1.msra.mxu1 %v1136_v62  ;;  %500 = vmatprep.subr.mxu0 %v1146_v3  ;;  %v1092_v3 = vld [vmem:[%s1446_s2 + $0x20] sm:$0xff] }
  0xb3   : > { %v1154_v7 = vpop.eup %1153  ;;  %589 = vmatprep.subr.mxu1 %v1148_v4  ;;  %501 = vmatpush1.msra.mxu0 %v1140_v0 }
  0xb4   : > { %v1156_v9 = vpop.eup %1155  ;;  %590 = vmatpush1.msra.mxu1 %v1150_v5  ;;  %502 = vmatprep.subr.mxu0 %v1154_v7  ;;  %v1094_v7 = vld [vmem:[%s1446_s2 + $0x30] sm:$0xff] }
  0xb5   : > { %v1158_v10 = vpop.eup %1157  ;;  %591 = vmatprep.subr.mxu1 %v1156_v9  ;;  %503 = vmatpush1.msra.mxu0 %v1152_v6  ;;  %v1093_v6 = vld [vmem:[%s1446_s2 + $0x28] sm:$0xff]  ;;  %v669_v9 = vpop.permute.xlu0 %668 }
  0xb6   : > { %592 = vmatpush1.msra.mxu1 %v1158_v10  ;;  %1096 = vmatmul.mubr.msk.f32.vlgmr.msra.gmra.mxu0 %vm459_vm0, %v430_v8 }
  0xb7   : > { %1100 = vmatmul.mubr.msk.f32.vlgmr.msra.gmra.mxu1 %vm459_vm0, %v430_v8  ;;  %542 = vmatprep.mubr.f32.mxu0 %v1232_v26  ;;  %v1095_v8 = vld [vmem:[%s1446_s2 + $0x38] sm:$0xff] }
  0xb8   : > { %631 = vmatprep.mubr.f32.mxu1 %v1232_v26 }
  0xba   : > { %1097 = vmatmul.mubr.msk.f32.gmra.mxu0 %vm459_vm0, %v431_v11 }
  0xbb   : > { %1101 = vmatmul.mubr.msk.f32.gmra.mxu1 %vm459_vm0, %v431_v11  ;;  %548 = vmatprep.mubr.f32.mxu0 %v1232_v26 }
  0xbc   : > { %637 = vmatprep.mubr.f32.mxu1 %v1232_v26 }
  0xbe   : > { %1098 = vmatmul.mubr.msk.f32.gmra.mxu0 %vm459_vm0, %v432_v12 }
  0xbf   : > { %1102 = vmatmul.mubr.msk.f32.gmra.mxu1 %vm459_vm0, %v432_v12  ;;  %554 = vmatprep.mubr.f32.mxu0 %v1232_v26 }
  0xc0   : > { %643 = vmatprep.mubr.f32.mxu1 %v1232_v26 }
  0xc2   : > { %1099 = vmatmul.mubr.msk.f32.gmra.mxu0 %vm459_vm0, %v433_v13 }
  0xc3   : > { %1103 = vmatmul.mubr.msk.f32.gmra.mxu1 %vm459_vm0, %v433_v13  ;;  %762 = vmatprep.mubr.f32.mxu0 %v1232_v26 }
  0xc4   : > { %851 = vmatprep.mubr.f32.mxu1 %v1232_v26 }
 0x176   : > { %v538_v15 = vpop.f32.mrf.mxu0 }
 0x177   : > { %v627_v17 = vpop.f32.mrf.mxu1  ;;  %v539_v23 = vadd.f32 %v538_v15, %v442_v21 }
 0x178   : > { %v540_v18 = vpop.f32.mrf.mxu0  ;;  %v628_v44 = vadd.f32 %v627_v17, %v442_v21  ;;  %v674_v17 = vpop.permute.xlu1 %673 }
 0x179   : > { %v629_v19 = vpop.f32.mrf.mxu1  ;;  %v541_v28 = vadd.f32 %v540_v18, %v442_v21  ;;  %1159 = vtanh.f32 %v539_v23 }
 0x17a   : > { %v544_v20 = vpop.f32.mrf.mxu0  ;;  %v630_v57 = vadd.f32 %v629_v19, %v442_v21 }
 0x17b   : > { %v633_v22 = vpop.f32.mrf.mxu1  ;;  %v545_v31 = vadd.f32 %v544_v20, %v447_v25  ;;  %1161 = vtanh.f32 %v541_v28 }
 0x17c   : > { %v546_v24 = vpop.f32.mrf.mxu0  ;;  %v634_v49 = vadd.f32 %v633_v22, %v447_v25 }
 0x17d   : > { %v635_v29 = vpop.f32.mrf.mxu1  ;;  %v547_v33 = vadd.f32 %v546_v24, %v447_v25  ;;  %1163 = vtanh.f32 %v545_v31 }
 0x17e   : > { %v550_v32 = vpop.f32.mrf.mxu0  ;;  %v636_v43 = vadd.f32 %v635_v29, %v447_v25  ;;  %v679_v25 = vpop.permute.xlu0 %678 }
 0x17f   : > { %v639_v34 = vpop.f32.mrf.mxu1  ;;  %v551_v35 = vadd.f32 %v550_v32, %v452_v14  ;;  %1165 = vtanh.f32 %v547_v33 }
 0x180   : > { %v552_v36 = vpop.f32.mrf.mxu0  ;;  %v640_v56 = vadd.f32 %v639_v34, %v452_v14 }
 0x181   : > { %v553_v37 = vadd.f32 %v552_v36, %v452_v14  ;;  %v641_v38 = vpop.f32.mrf.mxu1  ;;  %1167 = vtanh.f32 %v551_v35 }
 0x182   : > { %v556_v39 = vpop.f32.mrf.mxu0  ;;  %v642_v55 = vadd.f32 %v641_v38, %v452_v14 }
 0x183   : > { %v557_v40 = vadd.f32 %v556_v39, %v457_v16  ;;  %v645_v51 = vpop.f32.mrf.mxu1  ;;  %1169 = vtanh.f32 %v553_v37  ;;  %v684_v37 = vpop.permute.xlu1 %683 }
 0x184   : > { %v558_v52 = vpop.f32.mrf.mxu0  ;;  %v646_v53 = vadd.f32 %v645_v51, %v457_v16 }
 0x185   : > { %v559_v54 = vadd.f32 %v558_v52, %v457_v16  ;;  %v647_v41 = vpop.f32.mrf.mxu1  ;;  %1171 = vtanh.f32 %v557_v40 }
 0x186   : > { %v648_v48 = vadd.f32 %v647_v41, %v457_v16  ;;  %v1160_v58 = vpop.eup %1159 }
 0x187   : > { %1173 = vtanh.f32 %v559_v54 }
 0x188   : > { %1175 = vtanh.f32 %v648_v48  ;;  %v1162_v42 = vpop.eup %1161 }
 0x189   : > { %1177 = vtanh.f32 %v646_v53 }
 0x18a   : > { %1179 = vtanh.f32 %v642_v55  ;;  %v1164_v46 = vpop.eup %1163 }
 0x18b   : > { %1181 = vtanh.f32 %v640_v56 }
 0x18c   : > { %1183 = vtanh.f32 %v636_v43  ;;  %v1166_v59 = vpop.eup %1165 }
 0x18d   : > { %1185 = vtanh.f32 %v634_v49  ;;  %v895_v49 = vpop.permute.xlu0 %894 }
 0x18e   : > { %1187 = vtanh.f32 %v630_v57  ;;  %v1168_v47 = vpop.eup %1167 }
 0x18f   : > { %1189 = vtanh.f32 %v628_v44 }
 0x190   : > { %v1170_v45 = vpop.eup %1169 }
 0x192   : > { %v1172_v50 = vpop.eup %1171 }
 0x194   : > { %v1174_v60 = vpop.eup %1173 }
 0x195   : > { %v1176_v61 = vpop.eup %1175  ;;  %722 = vmatprep.subr.mxu0 %v1174_v60 }
 0x196   : > { %v1178_v62 = vpop.eup %1177  ;;  %811 = vmatprep.subr.mxu1 %v1176_v61  ;;  %723 = vmatpush1.msra.mxu0 %v1172_v50  ;;  %v905_v50 = vpop.permute.xlu0 %904 }
 0x197   : > { %v1180_v63 = vpop.eup %1179  ;;  %812 = vmatpush1.msra.mxu1 %v1178_v62  ;;  %724 = vmatprep.subr.mxu0 %v1170_v45 }
 0x198   : > { %v1182_v0 = vpop.eup %1181  ;;  %813 = vmatprep.subr.mxu1 %v1180_v63  ;;  %725 = vmatpush1.msra.mxu0 %v1168_v47 }
 0x199   : > { %v1184_v1 = vpop.eup %1183  ;;  %814 = vmatpush1.msra.mxu1 %v1182_v0  ;;  %726 = vmatprep.subr.mxu0 %v1166_v59 }
 0x19a   : > { %v1186_v2 = vpop.eup %1185  ;;  %815 = vmatprep.subr.mxu1 %v1184_v1  ;;  %727 = vmatpush1.msra.mxu0 %v1164_v46  ;;  %v900_v46 = vpop.permute.xlu1 %899 }
 0x19b   : > { %v1188_v4 = vpop.eup %1187  ;;  %816 = vmatpush1.msra.mxu1 %v1186_v2  ;;  %728 = vmatprep.subr.mxu0 %v1162_v42 }
 0x19c   : > { %v1190_v5 = vpop.eup %1189  ;;  %817 = vmatprep.subr.mxu1 %v1188_v4  ;;  %729 = vmatpush1.msra.mxu0 %v1160_v58 }
 0x19d   : > { %818 = vmatpush1.msra.mxu1 %v1190_v5  ;;  %1104 = vmatmul.mubr.msk.f32.vlgmr.msra.gmra.mxu0 %vm459_vm0, %v1092_v3 }
 0x19e   : > { %1108 = vmatmul.mubr.msk.f32.vlgmr.msra.gmra.mxu1 %vm459_vm0, %v1092_v3  ;;  %768 = vmatprep.mubr.f32.mxu0 %v1232_v26 }
 0x19f   : > { %857 = vmatprep.mubr.f32.mxu1 %v1232_v26 }
 0x1a1   : > { %1105 = vmatmul.mubr.msk.f32.gmra.mxu0 %vm459_vm0, %v1093_v6 }
 0x1a2   : > { %1109 = vmatmul.mubr.msk.f32.gmra.mxu1 %vm459_vm0, %v1093_v6  ;;  %774 = vmatprep.mubr.f32.mxu0 %v1232_v26 }
 0x1a3   : > { %863 = vmatprep.mubr.f32.mxu1 %v1232_v26 }
 0x1a5   : > { %1106 = vmatmul.mubr.msk.f32.gmra.mxu0 %vm459_vm0, %v1094_v7 }
 0x1a6   : > { %1110 = vmatmul.mubr.msk.f32.gmra.mxu1 %vm459_vm0, %v1094_v7  ;;  %780 = vmatprep.mubr.f32.mxu0 %v1232_v26 }
 0x1a7   : > { %869 = vmatprep.mubr.f32.mxu1 %v1232_v26 }
 0x1a9   : > { %1107 = vmatmul.mubr.msk.f32.gmra.mxu0 %vm459_vm0, %v1095_v8 }
 0x1aa   : > { %1111 = vmatmul.mubr.msk.f32.gmra.mxu1 %vm459_vm0, %v1095_v8 }
 0x25d   : > { %v764_v10 = vpop.f32.mrf.mxu0 }
 0x25e   : > { %v765_v11 = vadd.f32 %v764_v10, %v669_v9  ;;  %v853_v12 = vpop.f32.mrf.mxu1  ;;  %v910_v10 = vpop.permute.xlu1 %909 }
 0x25f   : > { %v854_v13 = vadd.f32 %v853_v12, %v669_v9  ;;  %v766_v14 = vpop.f32.mrf.mxu0 }
 0x260   : > { %1191 = vtanh.f32 %v765_v11  ;;  %v767_v15 = vadd.f32 %v766_v14, %v669_v9  ;;  %v855_v16 = vpop.f32.mrf.mxu1 }
 0x261   : > { %1193 = vtanh.f32 %v854_v13  ;;  %v856_v18 = vadd.f32 %v855_v16, %v669_v9  ;;  %v770_v19 = vpop.f32.mrf.mxu0 }
 0x262   : > { %1195 = vtanh.f32 %v767_v15  ;;  %v771_v20 = vadd.f32 %v770_v19, %v674_v17  ;;  %v859_v26 = vpop.f32.mrf.mxu1 }
 0x263   : > { %1197 = vtanh.f32 %v856_v18  ;;  %v860_v21 = vadd.f32 %v859_v26, %v674_v17  ;;  %v772_v22 = vpop.f32.mrf.mxu0 }
 0x264   : > { %1199 = vtanh.f32 %v771_v20  ;;  %v773_v23 = vadd.f32 %v772_v22, %v674_v17  ;;  %v861_v24 = vpop.f32.mrf.mxu1 }
 0x265   : > { %1201 = vtanh.f32 %v860_v21  ;;  %v862_v28 = vadd.f32 %v861_v24, %v674_v17  ;;  %v776_v29 = vpop.f32.mrf.mxu0 }
 0x266   : > { %1203 = vtanh.f32 %v773_v23  ;;  %v777_v31 = vadd.f32 %v776_v29, %v679_v25  ;;  %v865_v32 = vpop.f32.mrf.mxu1 }
 0x267   : > { %1205 = vtanh.f32 %v862_v28  ;;  %v866_v33 = vadd.f32 %v865_v32, %v679_v25  ;;  %v778_v34 = vpop.f32.mrf.mxu0 }
 0x268   : > { %1207 = vtanh.f32 %v777_v31  ;;  %v779_v35 = vadd.f32 %v778_v34, %v679_v25  ;;  %v867_v36 = vpop.f32.mrf.mxu1 }
 0x269   : > { %1209 = vtanh.f32 %v866_v33  ;;  %v868_v38 = vadd.f32 %v867_v36, %v679_v25  ;;  %v782_v39 = vpop.f32.mrf.mxu0 }
 0x26a   : > { %1211 = vtanh.f32 %v779_v35  ;;  %v783_v40 = vadd.f32 %v782_v39, %v684_v37  ;;  %v871_v51 = vpop.f32.mrf.mxu1 }
 0x26b   : > { %1213 = vtanh.f32 %v868_v38  ;;  %v872_v52 = vadd.f32 %v871_v51, %v684_v37  ;;  %v784_v53 = vpop.f32.mrf.mxu0 }
 0x26c   : > { %1215 = vtanh.f32 %v783_v40  ;;  %v785_v54 = vadd.f32 %v784_v53, %v684_v37  ;;  %v873_v41 = vpop.f32.mrf.mxu1 }
 0x26d   : > { %v1192_v55 = vpop.eup %1191  ;;  %1217 = vtanh.f32 %v872_v52  ;;  %v874_v48 = vadd.f32 %v873_v41, %v684_v37  ;;  %v1233_v41 = vmov 1966171168  }
 0x26e   : > { %v1194_v56 = vpop.eup %1193  ;;  %1219 = vtanh.f32 %v785_v54  ;;  %v912_v62 = vmul.f32 %v1192_v55, %v895_v49  ;;  %v980_v55 = vunpack.c.l.s4 %v1233_v41 }
 0x26f   : > { %v1196_v43 = vpop.eup %1195  ;;  %1221 = vtanh.f32 %v874_v48  ;;  %v914_v2 = vmul.f32 %v1194_v56, %v895_v49 }
 0x270   : > { %v1198_v57 = vpop.eup %1197  ;;  %v913_v6 = vmul.f32 %v1196_v43, %v895_v49 }
 0x271   : > { %v1200_v44 = vpop.eup %1199  ;;  %v915_v11 = vmul.f32 %v1198_v57, %v895_v49 }
 0x272   : > { %v1202_v58 = vpop.eup %1201  ;;  %v916_v47 = vmul.f32 %v1200_v44, %v900_v46 }
 0x273   : > { %v1204_v42 = vpop.eup %1203  ;;  %v918_v60 = vmul.f32 %v1202_v58, %v900_v46 }
 0x274   : > { %v1206_v59 = vpop.eup %1205  ;;  %v917_v63 = vmul.f32 %v1204_v42, %v900_v46  ;;  %v928_v7 = vadd.f32 %v916_v47, %v912_v62 }
 0x275   : > { %v1208_v45 = vpop.eup %1207  ;;  %v919_v3 = vmul.f32 %v1206_v59, %v900_v46  ;;  %v946_v12 = vadd.f32 %v918_v60, %v914_v2  ;;  %v981_v46 = vunpack.c.0.s8 %v980_v55 }
 0x276   : > { %v1210_v61 = vpop.eup %1209  ;;  %v920_v0 = vmul.f32 %v1208_v45, %v905_v50  ;;  %v937_v15 = vadd.f32 %v917_v63, %v913_v6 }
 0x277   : > { %v1212_v1 = vpop.eup %1211  ;;  %v922_v4 = vmul.f32 %v1210_v61, %v905_v50  ;;  %v955_v19 = vadd.f32 %v919_v3, %v915_v11  ;;  %v984_v63 = vsub.s32 %v981_v46, %v1349_v30 }
 0x278   : > { %v1214_v5 = vpop.eup %1213  ;;  %v921_v8 = vmul.f32 %v1212_v1, %v905_v50  ;;  %v929_v16 = vadd.f32 %v928_v7, %v920_v0 }
 0x279   : > { %v1216_v9 = vpop.eup %1215  ;;  %v923_v13 = vmul.f32 %v1214_v5, %v905_v50  ;;  %v947_v20 = vadd.f32 %v946_v12, %v922_v4  ;;  %v967_v50 = vpop.permute.xlu0 %966 }
 0x27a   : > { %v1218_v14 = vpop.eup %1217  ;;  %v924_v17 = vmul.f32 %v1216_v9, %v910_v10  ;;  %v938_v22 = vadd.f32 %v937_v15, %v921_v8 }
 0x27b   : > { %v1220_v18 = vpop.eup %1219  ;;  %v926_v26 = vmul.f32 %v1218_v14, %v910_v10  ;;  %v956_v25 = vadd.f32 %v955_v19, %v923_v13 }
 0x27c   : > { %v1222_v21 = vpop.eup %1221  ;;  %v930_v23 = vadd.f32 %v929_v16, %v924_v17  ;;  %v925_v24 = vmul.f32 %v1220_v18, %v910_v10 }
 0x27d   : > { %v948_v28 = vadd.f32 %v947_v20, %v926_v26  ;;  %v927_v29 = vmul.f32 %v1222_v21, %v910_v10 }
 0x27e   : > { %v931_v31 = vrot.slane %v930_v23, 4  ;;  %v939_v32 = vadd.f32 %v938_v22, %v925_v24 }
 0x27f   : > { %v949_v33 = vrot.slane %v948_v28, 4  ;;  %v957_v34 = vadd.f32 %v956_v25, %v927_v29 }
 0x280   : > { %v932_v35 = vadd.f32 %v931_v31, %v930_v23  ;;  %v940_v36 = vrot.slane %v939_v32, 4 }
 0x281   : > { %v950_v37 = vadd.f32 %v949_v33, %v948_v28  ;;  %v958_v38 = vrot.slane %v957_v34, 4 }
 0x282   : > { %v933_v39 = vrot.slane %v932_v35, 2  ;;  %v941_v40 = vadd.f32 %v940_v36, %v939_v32 }
 0x283   : > { %v951_v51 = vrot.slane %v950_v37, 2  ;;  %v959_v52 = vadd.f32 %v958_v38, %v957_v34 }
 0x284   : > { %v934_v53 = vadd.f32 %v933_v39, %v932_v35  ;;  %v942_v54 = vrot.slane %v941_v40, 2 }
 0x285   : > { %v952_v48 = vadd.f32 %v951_v51, %v950_v37  ;;  %v960_v56 = vrot.slane %v959_v52, 2 }
 0x286   : > { %v935_v43 = vrot.slane %v934_v53, 1  ;;  %v943_v49 = vadd.f32 %v942_v54, %v941_v40 }
 0x287   : > { %v953_v57 = vrot.slane %v952_v48, 1  ;;  %v961_v44 = vadd.f32 %v960_v56, %v959_v52 }
 0x288   : > { %v936_v58 = vadd.f32 %v935_v43, %v934_v53  ;;  %v944_v42 = vrot.slane %v943_v49, 1 }
 0x289   : > { %v954_v59 = vadd.f32 %v953_v57, %v952_v48  ;;  %v962_v47 = vrot.slane %v961_v44, 1 }
 0x28a   : > { %v945_v45 = vadd.f32 %v944_v42, %v943_v49  ;;  %v969_v61 = vadd.f32 %v967_v50, %v936_v58 }
 0x28b   : > { %v963_v60 = vadd.f32 %v962_v47, %v961_v44  ;;  %v971_v0 = vadd.f32 %v967_v50, %v954_v59 }
 0x28c   : > { %v970_v62 = vadd.f32 %v967_v50, %v945_v45 }
 0x28d   : > { %v972_v1 = vadd.f32 %v967_v50, %v963_v60 }
 0x28e   : > { %v977_v2 = vcombine.low %v969_v61, %v970_v62 }
 0x28f   : > { %v978_v3 = vcombine.low %v971_v0, %v972_v1 }
 0x290   : > { %v985_v4 = vrot.slane %v977_v2, %v984_v63 }
 0x291   : > { %v992_v5 = vrot.slane %v978_v3, %v984_v63 }
 0x293   : > { %v993_v6 = vcombine.low %v985_v4, %v992_v5 }
 0x295   : > { %v1000_v7 = vrot.slane %v993_v6, %v984_v63 }
 0x297   : > { %1006 = vst.msk [vmem:[%s213_s20] sm:$0xf] %vm1004_vm1, %v1000_v7 }
 0x298 PF: > { %s14_s15 = sadd.s32 1, %s1229_s15  }
 0x299   : > { %p11_p4 = scmp.ge.s32.totalorder %s14_s15, 4  }
 0x29b   :  { %13 = sbr.rel (!%p11_p4) target bundleno = 1 (0x1), region = 76 }

</bundles_post_ra>
